<compile_context>
chip_gen: v6e
topology: v6e:2x2x1
jax: 0.10.0
libtpu: 0.0.40
codegen_flags: <defaults>
</compile_context>

<pallas_src>
import jax
import jax.numpy as jnp
from jax.experimental import pallas as pl
from jax.experimental.pallas import tpu as pltpu


def _round_up(x, m):
    return (x + m - 1) // m * m


def _mlp_kernel(x_ref, w1_ref, wmid_ref, wout_ref, bh_ref, bo_ref, out_ref):
    """One batch tile of the full 7-layer MLP.

    All weights/biases are VMEM-resident (constant index_map across batch
    tiles).  Matmuls run on the MXU with bf16 inputs and f32 accumulation;
    bias add + ReLU run on the VPU in f32, result re-cast to bf16 right away.
    """
    h = x_ref[...].astype(jnp.bfloat16)

    # hidden1 : (n_feature -> n_hidden) + ReLU
    h = jnp.dot(h, w1_ref[...], preferred_element_type=jnp.float32)
    h = jnp.maximum(h + bh_ref[0:1, :], 0.0).astype(jnp.bfloat16)

    # hidden2..hidden6 : (n_hidden -> n_hidden) + ReLU (static unroll)
    for i in range(5):
        h = jnp.dot(h, wmid_ref[i], preferred_element_type=jnp.float32)
        h = jnp.maximum(h + bh_ref[i + 1:i + 2, :], 0.0).astype(jnp.bfloat16)

    # predict : (n_hidden -> n_out), no activation
    out = jnp.dot(h, wout_ref[...], preferred_element_type=jnp.float32)
    out_ref[...] = out + bo_ref[...]


def init_params(key, n_feature, n_hidden, n_out):
    """PyTorch-convention params: weight (out, in), bias (out,)."""
    dims = [(n_hidden, n_feature)] + [(n_hidden, n_hidden)] * 5 + [(n_out, n_hidden)]
    params = []
    for i, (dout, din) in enumerate(dims):
        kw, kb = jax.random.split(jax.random.fold_in(key, i))
        bound = 1.0 / jnp.sqrt(din)  # PyTorch default init
        w = jax.random.uniform(kw, (dout, din), jnp.float32, -bound, bound)
        b = jax.random.uniform(kb, (dout,), jnp.float32, -bound, bound)
        params.append((w, b))
    return params


def pack_params(params):
    """One-time packing (outside jit): transpose to (in, out), stack, cast."""
    n_hidden = params[0][0].shape[0]
    w1 = jnp.asarray(params[0][0], jnp.float32).T.astype(jnp.bfloat16)
    wmid = jnp.stack(
        [jnp.asarray(w, jnp.float32).T for (w, _) in params[1:6]]
    ).astype(jnp.bfloat16)                                   # (5, n_hidden, n_hidden)
    wout = jnp.asarray(params[6][0], jnp.float32).T.astype(jnp.bfloat16)
    bh = jnp.zeros((8, n_hidden), jnp.float32)               # 6 biases, pad to 8 rows
    for i in range(6):
        bh = bh.at[i].set(jnp.asarray(params[i][1], jnp.float32))
    bo = jnp.asarray(params[6][1], jnp.float32).reshape(1, -1)
    return (w1, wmid, wout, bh, bo)


@jax.jit
def net_forward(x, packed):
    w1, wmid, wout, bh, bo = packed
    batch, n_feature = x.shape
    n_hidden = w1.shape[1]
    n_out = wout.shape[1]

    # Batch tile selection (all Python-level on static shapes):
    #  * up to 2048 rows per step (multiple of 8 sublanes),
    #  * for batch > 256, guarantee >= 2 grid steps so v7x's two TensorCores
    #    both get work; one extra step is negligible on 1-TC v5e/v6e.
    MAX_TM = 2048
    if batch > 256:
        tm = min(MAX_TM, _round_up(pl.cdiv(batch, 2), 8))
    else:
        tm = _round_up(max(batch, 1), 8)
    grid = (pl.cdiv(batch, tm),)   # partial tail block handled by Pallas
                                   # (padded reads, masked writes; rows indep.)

    const2 = lambda i: (0, 0)
    const3 = lambda i: (0, 0, 0)

    flops = 2 * batch * (n_feature * n_hidden
                         + 5 * n_hidden * n_hidden
                         + n_hidden * n_out)
    bytes_accessed = (x.size * x.dtype.itemsize
                      + w1.size * 2 + wmid.size * 2 + wout.size * 2
                      + bh.size * 4 + bo.size * 4
                      + batch * n_out * 4)

    out = pl.pallas_call(
        _mlp_kernel,
        out_shape=jax.ShapeDtypeStruct((batch, n_out), jnp.float32),
        grid_spec=pltpu.PrefetchScalarGridSpec(
            num_scalar_prefetch=0,
            grid=grid,
            in_specs=[
                pl.BlockSpec((tm, n_feature), lambda i: (i, 0)),        # x tile
                pl.BlockSpec((n_feature, n_hidden), const2),            # w1 (resident)
                pl.BlockSpec((5, n_hidden, n_hidden), const3),          # wmid (resident)
                pl.BlockSpec((n_hidden, n_out), const2),                # wout (resident)
                pl.BlockSpec((8, n_hidden), const2),                    # hidden biases
                pl.BlockSpec((1, n_out), const2),                       # output bias
            ],
            out_specs=pl.BlockSpec((tm, n_out), lambda i: (i, 0)),
        ),
        compiler_params=pltpu.CompilerParams(
            dimension_semantics=("parallel",)),                          # 2 TCs on v7x
        cost_estimate=pl.CostEstimate(
            flops=flops, transcendentals=0, bytes_accessed=bytes_accessed),
    )(x, w1, wmid, wout, bh, bo)

    return out


def net_forward_ref(x, params):
    """Pure-JAX f32 reference matching the PyTorch module."""
    h = x
    for w, b in params[:-1]:
        h = jnp.maximum(h @ w.T + b, 0.0)
    w, b = params[-1]
    return h @ w.T + b


if __name__ == "__main__":
    n_feature, n_hidden, n_out = 16, 32, 4
    batch = 8

    key = jax.random.PRNGKey(0)
    kx, kp = jax.random.split(key)
    x = jax.random.normal(kx, (batch, n_feature), jnp.float32)
    params = init_params(kp, n_feature, n_hidden, n_out)
    packed = pack_params(params)        # one-time weight packing, outside jit

    out = net_forward(x, packed)
    out = jax.block_until_ready(out)

    ref = net_forward_ref(x, params)
    assert out.shape == (batch, n_out)
    # bf16 MXU inputs (f32 accumulation) over 7 layers -> loosened tolerance
    # vs the pure-f32 reference.
    assert jnp.allclose(out, ref, atol=3e-2, rtol=3e-2)

    print("KERNEL_OK")
</pallas_src>

<mosaic_0001>
module attributes {stable_mosaic.version = 11 : i64} {
  func.func @_mlp_kernel(%arg0: i32, %arg1: memref<8x16xf32, #tpu.memory_space<vmem>>, %arg2: memref<16x32xbf16, #tpu.memory_space<vmem>>, %arg3: memref<5x32x32xbf16, #tpu.memory_space<vmem>>, %arg4: memref<32x4xbf16, #tpu.memory_space<vmem>>, %arg5: memref<8x32xf32, #tpu.memory_space<vmem>>, %arg6: memref<1x4xf32, #tpu.memory_space<vmem>>, %arg7: memref<8x4xf32, #tpu.memory_space<vmem>>) attributes {dimension_semantics = [#tpu.dimension_semantics<parallel>], iteration_bounds = array<i64: 1>, scalar_prefetch = 0 : i64, scratch_operands = 0 : i64, tpu.core_type = #tpu.core_type<tc>, window_params = [{transform_indices = @transform_0, window_bounds = array<i64: 8, 16>}, {pipeline_mode = #tpu.pipeline_mode<synchronous>, transform_indices = @transform_1, window_bounds = array<i64: 16, 32>}, {pipeline_mode = #tpu.pipeline_mode<synchronous>, transform_indices = @transform_2, window_bounds = array<i64: 5, 32, 32>}, {pipeline_mode = #tpu.pipeline_mode<synchronous>, transform_indices = @transform_3, window_bounds = array<i64: 32, 4>}, {pipeline_mode = #tpu.pipeline_mode<synchronous>, transform_indices = @transform_4, window_bounds = array<i64: 8, 32>}, {pipeline_mode = #tpu.pipeline_mode<synchronous>, transform_indices = @transform_5, window_bounds = array<i64: 1, 4>}, {transform_indices = @transform_6, window_bounds = array<i64: 8, 4>}]} {
    %c0 = arith.constant 0 : index
    %c0_0 = arith.constant 0 : index
    %0 = vector.load %arg1[%c0, %c0_0] : memref<8x16xf32, #tpu.memory_space<vmem>>, vector<8x16xf32>
    %1 = arith.truncf %0 : vector<8x16xf32> to vector<8x16xbf16>
    %c0_1 = arith.constant 0 : index
    %c0_2 = arith.constant 0 : index
    %2 = vector.load %arg2[%c0_1, %c0_2] : memref<16x32xbf16, #tpu.memory_space<vmem>>, vector<16x32xbf16>
    %cst = arith.constant dense<0.000000e+00> : vector<8x32xf32>
    %3 = tpu.matmul %1, %2, %cst {dimension_numbers = #tpu.dot_dimension_numbers<[1], [0], [0], [1], [0, 0, 1, 1], [], []>} : vector<8x16xbf16>, vector<16x32xbf16>, vector<8x32xf32> -> vector<8x32xf32>
    %c0_3 = arith.constant 0 : index
    %c0_4 = arith.constant 0 : index
    %4 = vector.load %arg5[%c0_3, %c0_4] : memref<8x32xf32, #tpu.memory_space<vmem>>, vector<1x32xf32>
    %5 = vector.broadcast %4 : vector<1x32xf32> to vector<8x32xf32>
    %6 = arith.addf %3, %5 : vector<8x32xf32>
    %cst_5 = arith.constant 0.000000e+00 : f32
    %7 = vector.broadcast %cst_5 : f32 to vector<8x32xf32>
    %8 = arith.maximumf %6, %7 : vector<8x32xf32>
    %9 = arith.truncf %8 : vector<8x32xf32> to vector<8x32xbf16>
    %c0_6 = arith.constant 0 : index
    %c0_7 = arith.constant 0 : index
    %c0_8 = arith.constant 0 : index
    %10 = vector.load %arg3[%c0_6, %c0_7, %c0_8] : memref<5x32x32xbf16, #tpu.memory_space<vmem>>, vector<1x32x32xbf16>
    %11 = vector.shape_cast %10 : vector<1x32x32xbf16> to vector<32x32xbf16>
    %cst_9 = arith.constant dense<0.000000e+00> : vector<8x32xf32>
    %12 = tpu.matmul %9, %11, %cst_9 {dimension_numbers = #tpu.dot_dimension_numbers<[1], [0], [0], [1], [0, 0, 1, 1], [], []>} : vector<8x32xbf16>, vector<32x32xbf16>, vector<8x32xf32> -> vector<8x32xf32>
    %c1 = arith.constant 1 : index
    %c0_10 = arith.constant 0 : index
    %13 = vector.load %arg5[%c1, %c0_10] : memref<8x32xf32, #tpu.memory_space<vmem>>, vector<1x32xf32>
    %14 = vector.broadcast %13 : vector<1x32xf32> to vector<8x32xf32>
    %15 = arith.addf %12, %14 : vector<8x32xf32>
    %cst_11 = arith.constant 0.000000e+00 : f32
    %16 = vector.broadcast %cst_11 : f32 to vector<8x32xf32>
    %17 = arith.maximumf %15, %16 : vector<8x32xf32>
    %18 = arith.truncf %17 : vector<8x32xf32> to vector<8x32xbf16>
    %c1_12 = arith.constant 1 : index
    %c0_13 = arith.constant 0 : index
    %c0_14 = arith.constant 0 : index
    %19 = vector.load %arg3[%c1_12, %c0_13, %c0_14] : memref<5x32x32xbf16, #tpu.memory_space<vmem>>, vector<1x32x32xbf16>
    %20 = vector.shape_cast %19 : vector<1x32x32xbf16> to vector<32x32xbf16>
    %cst_15 = arith.constant dense<0.000000e+00> : vector<8x32xf32>
    %21 = tpu.matmul %18, %20, %cst_15 {dimension_numbers = #tpu.dot_dimension_numbers<[1], [0], [0], [1], [0, 0, 1, 1], [], []>} : vector<8x32xbf16>, vector<32x32xbf16>, vector<8x32xf32> -> vector<8x32xf32>
    %c2 = arith.constant 2 : index
    %c0_16 = arith.constant 0 : index
    %22 = vector.load %arg5[%c2, %c0_16] : memref<8x32xf32, #tpu.memory_space<vmem>>, vector<1x32xf32>
    %23 = vector.broadcast %22 : vector<1x32xf32> to vector<8x32xf32>
    %24 = arith.addf %21, %23 : vector<8x32xf32>
    %cst_17 = arith.constant 0.000000e+00 : f32
    %25 = vector.broadcast %cst_17 : f32 to vector<8x32xf32>
    %26 = arith.maximumf %24, %25 : vector<8x32xf32>
    %27 = arith.truncf %26 : vector<8x32xf32> to vector<8x32xbf16>
    %c2_18 = arith.constant 2 : index
    %c0_19 = arith.constant 0 : index
    %c0_20 = arith.constant 0 : index
    %28 = vector.load %arg3[%c2_18, %c0_19, %c0_20] : memref<5x32x32xbf16, #tpu.memory_space<vmem>>, vector<1x32x32xbf16>
    %29 = vector.shape_cast %28 : vector<1x32x32xbf16> to vector<32x32xbf16>
    %cst_21 = arith.constant dense<0.000000e+00> : vector<8x32xf32>
    %30 = tpu.matmul %27, %29, %cst_21 {dimension_numbers = #tpu.dot_dimension_numbers<[1], [0], [0], [1], [0, 0, 1, 1], [], []>} : vector<8x32xbf16>, vector<32x32xbf16>, vector<8x32xf32> -> vector<8x32xf32>
    %c3 = arith.constant 3 : index
    %c0_22 = arith.constant 0 : index
    %31 = vector.load %arg5[%c3, %c0_22] : memref<8x32xf32, #tpu.memory_space<vmem>>, vector<1x32xf32>
    %32 = vector.broadcast %31 : vector<1x32xf32> to vector<8x32xf32>
    %33 = arith.addf %30, %32 : vector<8x32xf32>
    %cst_23 = arith.constant 0.000000e+00 : f32
    %34 = vector.broadcast %cst_23 : f32 to vector<8x32xf32>
    %35 = arith.maximumf %33, %34 : vector<8x32xf32>
    %36 = arith.truncf %35 : vector<8x32xf32> to vector<8x32xbf16>
    %c3_24 = arith.constant 3 : index
    %c0_25 = arith.constant 0 : index
    %c0_26 = arith.constant 0 : index
    %37 = vector.load %arg3[%c3_24, %c0_25, %c0_26] : memref<5x32x32xbf16, #tpu.memory_space<vmem>>, vector<1x32x32xbf16>
    %38 = vector.shape_cast %37 : vector<1x32x32xbf16> to vector<32x32xbf16>
    %cst_27 = arith.constant dense<0.000000e+00> : vector<8x32xf32>
    %39 = tpu.matmul %36, %38, %cst_27 {dimension_numbers = #tpu.dot_dimension_numbers<[1], [0], [0], [1], [0, 0, 1, 1], [], []>} : vector<8x32xbf16>, vector<32x32xbf16>, vector<8x32xf32> -> vector<8x32xf32>
    %c4 = arith.constant 4 : index
    %c0_28 = arith.constant 0 : index
    %40 = vector.load %arg5[%c4, %c0_28] : memref<8x32xf32, #tpu.memory_space<vmem>>, vector<1x32xf32>
    %41 = vector.broadcast %40 : vector<1x32xf32> to vector<8x32xf32>
    %42 = arith.addf %39, %41 : vector<8x32xf32>
    %cst_29 = arith.constant 0.000000e+00 : f32
    %43 = vector.broadcast %cst_29 : f32 to vector<8x32xf32>
    %44 = arith.maximumf %42, %43 : vector<8x32xf32>
    %45 = arith.truncf %44 : vector<8x32xf32> to vector<8x32xbf16>
    %c4_30 = arith.constant 4 : index
    %c0_31 = arith.constant 0 : index
    %c0_32 = arith.constant 0 : index
    %46 = vector.load %arg3[%c4_30, %c0_31, %c0_32] : memref<5x32x32xbf16, #tpu.memory_space<vmem>>, vector<1x32x32xbf16>
    %47 = vector.shape_cast %46 : vector<1x32x32xbf16> to vector<32x32xbf16>
    %cst_33 = arith.constant dense<0.000000e+00> : vector<8x32xf32>
    %48 = tpu.matmul %45, %47, %cst_33 {dimension_numbers = #tpu.dot_dimension_numbers<[1], [0], [0], [1], [0, 0, 1, 1], [], []>} : vector<8x32xbf16>, vector<32x32xbf16>, vector<8x32xf32> -> vector<8x32xf32>
    %c5 = arith.constant 5 : index
    %c0_34 = arith.constant 0 : index
    %49 = vector.load %arg5[%c5, %c0_34] : memref<8x32xf32, #tpu.memory_space<vmem>>, vector<1x32xf32>
    %50 = vector.broadcast %49 : vector<1x32xf32> to vector<8x32xf32>
    %51 = arith.addf %48, %50 : vector<8x32xf32>
    %cst_35 = arith.constant 0.000000e+00 : f32
    %52 = vector.broadcast %cst_35 : f32 to vector<8x32xf32>
    %53 = arith.maximumf %51, %52 : vector<8x32xf32>
    %54 = arith.truncf %53 : vector<8x32xf32> to vector<8x32xbf16>
    %c0_36 = arith.constant 0 : index
    %c0_37 = arith.constant 0 : index
    %55 = vector.load %arg4[%c0_36, %c0_37] : memref<32x4xbf16, #tpu.memory_space<vmem>>, vector<32x4xbf16>
    %cst_38 = arith.constant dense<0.000000e+00> : vector<8x4xf32>
    %56 = tpu.matmul %54, %55, %cst_38 {dimension_numbers = #tpu.dot_dimension_numbers<[1], [0], [0], [1], [0, 0, 1, 1], [], []>} : vector<8x32xbf16>, vector<32x4xbf16>, vector<8x4xf32> -> vector<8x4xf32>
    %c0_39 = arith.constant 0 : index
    %c0_40 = arith.constant 0 : index
    %57 = vector.load %arg6[%c0_39, %c0_40] : memref<1x4xf32, #tpu.memory_space<vmem>>, vector<1x4xf32>
    %58 = vector.broadcast %57 : vector<1x4xf32> to vector<8x4xf32>
    %59 = arith.addf %56, %58 : vector<8x4xf32>
    %c0_41 = arith.constant 0 : index
    %c0_42 = arith.constant 0 : index
    %60 = vector.load %arg7[%c0_41, %c0_42] : memref<8x4xf32, #tpu.memory_space<vmem>>, vector<8x4xf32>
    tpu.vector_store %arg7[%c0_41, %c0_42], %59 {strides = array<i32>} : memref<8x4xf32, #tpu.memory_space<vmem>>, vector<8x4xf32>,
    return
  }
  func.func @transform_0(%arg0: i32) -> (i32, i32) {
    %c0_i32 = arith.constant 0 : i32
    %c0_i32_0 = arith.constant 0 : i32
    return %arg0, %c0_i32 : i32, i32
  }
  func.func @transform_1(%arg0: i32) -> (i32, i32) {
    %c0_i32 = arith.constant 0 : i32
    %c0_i32_0 = arith.constant 0 : i32
    %c0_i32_1 = arith.constant 0 : i32
    return %c0_i32, %c0_i32_0 : i32, i32
  }
  func.func @transform_2(%arg0: i32) -> (i32, i32, i32) {
    %c0_i32 = arith.constant 0 : i32
    %c0_i32_0 = arith.constant 0 : i32
    %c0_i32_1 = arith.constant 0 : i32
    %c0_i32_2 = arith.constant 0 : i32
    return %c0_i32, %c0_i32_0, %c0_i32_1 : i32, i32, i32
  }
  func.func @transform_3(%arg0: i32) -> (i32, i32) {
    %c0_i32 = arith.constant 0 : i32
    %c0_i32_0 = arith.constant 0 : i32
    %c0_i32_1 = arith.constant 0 : i32
    return %c0_i32, %c0_i32_0 : i32, i32
  }
  func.func @transform_4(%arg0: i32) -> (i32, i32) {
    %c0_i32 = arith.constant 0 : i32
    %c0_i32_0 = arith.constant 0 : i32
    %c0_i32_1 = arith.constant 0 : i32
    return %c0_i32, %c0_i32_0 : i32, i32
  }
  func.func @transform_5(%arg0: i32) -> (i32, i32) {
    %c0_i32 = arith.constant 0 : i32
    %c0_i32_0 = arith.constant 0 : i32
    %c0_i32_1 = arith.constant 0 : i32
    return %c0_i32, %c0_i32_0 : i32, i32
  }
  func.func @transform_6(%arg0: i32) -> (i32, i32) {
    %c0_i32 = arith.constant 0 : i32
    %c0_i32_0 = arith.constant 0 : i32
    return %arg0, %c0_i32 : i32, i32
  }
}

</mosaic_0001>

<bundles_post_ra>
// kernel: net_forward.1
= control target key start
LH: loop header
LB: loop body
LE: loop exit
PB: predicated region body
PF: predicated region fallthrough
CT: control target
= control target key end

     0   :  { %11 = vsyncpa [#allocation3], 0  ;;  %s648_s21 = smov [#allocation2]   ;;  %s760_s0 = inlined_call_operand.vmem [shape: f32[8,16], index: 0, kind: input, shape index: {}]   ;;  %s761_s1 = inlined_call_operand.vmem [shape: bf16[16,32], index: 1, kind: input, shape index: {}]   ;;  %s762_s2 = inlined_call_operand.hbm [shape: bf16[5,32,32], index: 2, kind: input, shape index: {}]   ;;  %s763_s3 = inlined_call_operand.vmem [shape: bf16[32,4], index: 3, kind: input, shape index: {}]   ;;  %s764_s4 = inlined_call_operand.vmem [shape: f32[8,32], index: 4, kind: input, shape index: {}]   ;;  %s765_s5 = inlined_call_operand.vmem [shape: f32[1,4], index: 5, kind: input, shape index: {}]   ;;  %s766_s6 = inlined_call_operand.vmem [shape: f32[8,4], index: 6, kind: output, shape index: {}]  }
   0x1   :  { %s21_s22 = sshll.u32 %s648_s21, 4  ;;  %s22_s22 = int_to_ptr.vmem [resolvable:$true] %s21_s22 }
   0x2   :  { %s634_s23 = scalar_lea.vmem %s22_s22, 1280  ;;  %p639_p1 = scmp.lt.s32.totalorder %s22_s22, %s22_s22 }
   0x3   :  { %p635_p0 = scmp.ne.s32.totalorder %s22_s22, %s634_s23  ;;  %p640_p2 = scmp.lt.s32.totalorder %s634_s23, %s634_s23 }
   0x5   :  { %p641_p3 = por %p640_p2, %p639_p1 }
   0x7   :  { %p642_p4 = pnand %p641_p3, %p635_p0 }
   0x9   :  { %645 = shalt.err (!%p642_p4)
}
   0xa   :  { %s649_s24 = smov 64   ;;  %s650_s25 = smov 4  }
   0xb   :  { %27 = dma.hbm_to_vmem [thread:$0]  %s762_s2, 1280, %s22_s22, [#allocation3], %s649_s24, %s649_s24, %s650_s25  }
   0xc   :  { %646 = dma.done.wait [#allocation3], 1280  }
   0xd   :  { %647 = vsyncadd [#allocation3], 4294966016  ;;  %v651_v0 = vmov 0.0   ;;  %vm652_vm0 = vmmov 0   ;;  %v613_v1 = vld [vmem:[%s761_s1] sm:$0xff]   ;;  %vm53_vm1 = vcmask 130048  }
   0xe   :  { %554 = vmatprep.subr.bf16.mxu0 %v651_v0  ;;  %556 = vmatprep.mubr.msk.bf16.mxu0 %vm652_vm0, %v651_v0  ;;  %v38_v2 = vld [vmem:[%s760_s0] sm:$0xff]  ;;  %v614_v4 = vld [vmem:[#allocation2 + $0x8] sm:$0xff]   ;;  %v616_v6 = vld [vmem:[#allocation2 + $0x18] sm:$0xff]   ;;  %vm120_vm2 = vcmask 261120   ;;  %vm500_vm3 = vcmask 31744  }
   0xf   :  { %560 = vmatprep.subr.bf16.mxu1 %v651_v0  ;;  %564 = vmatprep.mubr.msk.bf16.mxu1 %vm652_vm0, %v651_v0  ;;  %v39_v3 = vpack.c.bf16 %v38_v2, %v38_v2  ;;  %v615_v5 = vld [vmem:[#allocation2] sm:$0xff]   ;;  %v617_v15 = vld [vmem:[#allocation2 + $0x10] sm:$0xff]   ;;  %v618_v16 = vld [vmem:[#allocation2 + $0x28] sm:$0xff]  }
  0x10   :  { %555 = vmatpush3.bf16.msra.mxu0 %v613_v1  ;;  %561 = vmatpush3.bf16.msra.mxu1 %v614_v4  ;;  %v507_v7 = vld [vmem:[%s764_s4] ss:$0 sm:$0xff]  ;;  %v510_v17 = vld [vmem:[%s764_s4 + $0x1] ss:$0 sm:$0xff]  ;;  %v620_v26 = vld [vmem:[#allocation2 + $0x38] sm:$0xff]  }
  0x11   :  { %568 = vmatprep.subr.bf16.mxu0 %v651_v0  ;;  %562 = vmatprep.subr.bf16.mxu1 %v651_v0  ;;  %v619_v25 = vld [vmem:[#allocation2 + $0x20] sm:$0xff]   ;;  %v621_v35 = vld [vmem:[#allocation2 + $0x30] sm:$0xff]   ;;  %v622_v36 = vld [vmem:[#allocation2 + $0x48] sm:$0xff]  }
  0x12   :  { %v514_v27 = vld [vmem:[%s764_s4 + $0x2] ss:$0 sm:$0xff]  ;;  %v518_v37 = vld [vmem:[%s764_s4 + $0x3] ss:$0 sm:$0xff]  ;;  %v624_v46 = vld [vmem:[%s763_s3 + $0x8] sm:$0xff]  }
  0x13   :  { %557 = vmatmul.mubr.msk.bf16.vlgmr.msra.gmra.mxu0 %vm53_vm1, %v39_v3  ;;  %v623_v45 = vld [vmem:[#allocation2 + $0x40] sm:$0xff]  }
  0x14   :  { %572 = vmatprep.mubr.msk.bf16.mxu0 %vm652_vm0, %v651_v0  ;;  %563 = vmatpush3.bf16.msra.mxu1 %v615_v5  ;;  %v522_v47 = vld [vmem:[%s764_s4 + $0x4] ss:$0 sm:$0xff]  ;;  %v526_v56 = vld [vmem:[%s764_s4 + $0x5] ss:$0 sm:$0xff] }
  0x15   :  { %576 = vmatprep.subr.bf16.mxu1 %v651_v0  ;;  %569 = vmatpush3.bf16.msra.mxu0 %v616_v6  ;;  %v625_v55 = vld [vmem:[%s763_s3] sm:$0xff]  }
  0x16   :  { %570 = vmatprep.subr.bf16.mxu0 %v651_v0 }
  0x19   :  { %571 = vmatpush3.bf16.msra.mxu0 %v617_v15 }
  0x1a   :  { %584 = vmatprep.subr.bf16.mxu0 %v651_v0 }
  0xd3   :  { %v91_v8 = vpop.f32.mrf.mxu0 }
  0xd4   :  { %v92_v9 = vadd.f32 %v507_v7, %v91_v8 }
  0xd5   :  { %v558_v10 = vpop.f32.mrf.mxu0 }
  0xd6   :  { %v97_v11 = vmax.f32 %v92_v9, 0.0 }
  0xd7   :  { %v94_v12 = vpop.f32.mrf.mxu0 }
  0xd8   :  { %v98_v13 = vpack.c.bf16 %v97_v11, %v97_v11 }
  0xd9   :  { %v559_v14 = vpop.f32.mrf.mxu0 }
  0xda   :  { %565 = vmatmul.mubr.msk.bf16.vlgmr.msra.gmra.mxu1 %vm120_vm2, %v98_v13 }
  0xdb   :  { %580 = vmatprep.mubr.msk.bf16.mxu1 %vm652_vm0, %v651_v0  ;;  %577 = vmatpush3.bf16.msra.mxu1 %v618_v16 }
  0xdc   :  { %578 = vmatprep.subr.bf16.mxu1 %v651_v0 }
  0xdf   :  { %579 = vmatpush3.bf16.msra.mxu1 %v619_v25 }
  0xe0   :  { %592 = vmatprep.subr.bf16.mxu1 %v651_v0 }
 0x19a   :  { %v158_v18 = vpop.f32.mrf.mxu1 }
 0x19b   :  { %v159_v19 = vadd.f32 %v510_v17, %v158_v18 }
 0x19c   :  { %v566_v20 = vpop.f32.mrf.mxu1 }
 0x19d   :  { %v164_v21 = vmax.f32 %v159_v19, 0.0 }
 0x19e   :  { %v161_v22 = vpop.f32.mrf.mxu1 }
 0x19f   :  { %v165_v23 = vpack.c.bf16 %v164_v21, %v164_v21 }
 0x1a0   :  { %v567_v24 = vpop.f32.mrf.mxu1 }
 0x1a1   :  { %573 = vmatmul.mubr.msk.bf16.vlgmr.msra.gmra.mxu0 %vm120_vm2, %v165_v23 }
 0x1a2   :  { %588 = vmatprep.mubr.msk.bf16.mxu0 %vm652_vm0, %v651_v0  ;;  %585 = vmatpush3.bf16.msra.mxu0 %v620_v26 }
 0x1a3   :  { %586 = vmatprep.subr.bf16.mxu0 %v651_v0 }
 0x1a6   :  { %587 = vmatpush3.bf16.msra.mxu0 %v621_v35 }
 0x1a7   :  { %600 = vmatprep.subr.bf16.mxu0 %v651_v0 }
 0x261   :  { %v225_v28 = vpop.f32.mrf.mxu0 }
 0x262   :  { %v226_v29 = vadd.f32 %v514_v27, %v225_v28 }
 0x263   :  { %v574_v30 = vpop.f32.mrf.mxu0 }
 0x264   :  { %v231_v31 = vmax.f32 %v226_v29, 0.0 }
 0x265   :  { %v228_v32 = vpop.f32.mrf.mxu0 }
 0x266   :  { %v232_v33 = vpack.c.bf16 %v231_v31, %v231_v31 }
 0x267   :  { %v575_v34 = vpop.f32.mrf.mxu0 }
 0x268   :  { %581 = vmatmul.mubr.msk.bf16.vlgmr.msra.gmra.mxu1 %vm120_vm2, %v232_v33 }
 0x269   :  { %596 = vmatprep.mubr.msk.bf16.mxu1 %vm652_vm0, %v651_v0  ;;  %593 = vmatpush3.bf16.msra.mxu1 %v622_v36 }
 0x26a   :  { %594 = vmatprep.subr.bf16.mxu1 %v651_v0 }
 0x26d   :  { %595 = vmatpush3.bf16.msra.mxu1 %v623_v45 }
 0x328   :  { %v292_v38 = vpop.f32.mrf.mxu1 }
 0x329   :  { %v293_v39 = vadd.f32 %v518_v37, %v292_v38 }
 0x32a   :  { %v582_v40 = vpop.f32.mrf.mxu1 }
 0x32b   :  { %v298_v41 = vmax.f32 %v293_v39, 0.0 }
 0x32c   :  { %v295_v42 = vpop.f32.mrf.mxu1 }
 0x32d   :  { %v299_v43 = vpack.c.bf16 %v298_v41, %v298_v41 }
 0x32e   :  { %v583_v44 = vpop.f32.mrf.mxu1 }
 0x32f   :  { %589 = vmatmul.mubr.msk.bf16.vlgmr.msra.gmra.mxu0 %vm120_vm2, %v299_v43 }
 0x330   :  { %604 = vmatprep.mubr.msk.bf16.mxu0 %vm652_vm0, %v651_v0  ;;  %601 = vmatpush3.bf16.msra.mxu0 %v624_v46 }
 0x331   :  { %602 = vmatprep.subr.bf16.mxu0 %v651_v0  ;;  %v530_v0 = vld [vmem:[%s765_s5] ss:$0 sm:$0xff] }
 0x334   :  { %603 = vmatpush3.bf16.msra.mxu0 %v625_v55 }
 0x3ef   :  { %v359_v48 = vpop.f32.mrf.mxu0 }
 0x3f0   :  { %v360_v49 = vadd.f32 %v522_v47, %v359_v48 }
 0x3f1   :  { %v590_v50 = vpop.f32.mrf.mxu0 }
 0x3f2   :  { %v365_v51 = vmax.f32 %v360_v49, 0.0 }
 0x3f3   :  { %v362_v52 = vpop.f32.mrf.mxu0 }
 0x3f4   :  { %v366_v53 = vpack.c.bf16 %v365_v51, %v365_v51 }
 0x3f5   :  { %v591_v54 = vpop.f32.mrf.mxu0 }
 0x3f6   :  { %597 = vmatmul.mubr.msk.bf16.vlgmr.msra.gmra.mxu1 %vm120_vm2, %v366_v53 }
 0x4b6   :  { %v426_v57 = vpop.f32.mrf.mxu1 }
 0x4b7   :  { %v427_v58 = vadd.f32 %v526_v56, %v426_v57 }
 0x4b8   :  { %v598_v59 = vpop.f32.mrf.mxu1 }
 0x4b9   :  { %v432_v60 = vmax.f32 %v427_v58, 0.0 }
 0x4ba   :  { %v429_v61 = vpop.f32.mrf.mxu1 }
 0x4bb   :  { %v433_v62 = vpack.c.bf16 %v432_v60, %v432_v60 }
 0x4bc   :  { %v599_v63 = vpop.f32.mrf.mxu1 }
 0x4bd   :  { %605 = vmatmul.mubr.msk.bf16.vlgmr.msra.gmra.mxu0 %vm120_vm2, %v433_v62 }
 0x57d   :  { %v494_v1 = vpop.f32.mrf.mxu0 }
 0x57e   :  { %v495_v2 = vadd.f32 %v530_v0, %v494_v1 }
 0x57f   :  { %v606_v3 = vpop.f32.mrf.mxu0 }
 0x580   :  { %501 = vst.msk [vmem:[%s766_s6] sm:$0xff] %vm500_vm3, %v495_v2 }
 0x581   :  { %v497_v4 = vpop.f32.mrf.mxu0 }
 0x583   :  { %v607_v5 = vpop.f32.mrf.mxu0 }
 0x584   :  { %506 = vsyncpa [#allocation3], 1 }

</bundles_post_ra>
